<compile_context>
chip_gen: v5e
topology: v5e:2x2
jax: 0.10.0
libtpu: 0.0.40
codegen_flags: <defaults>
</compile_context>

<pallas_src>
import jax
import jax.numpy as jnp
from jax import lax
from jax.experimental import pallas as pl
from jax.experimental.pallas import tpu as pltpu


def _round_up(v, m):
    return ((v + m - 1) // m) * m


def _head_kernel(x_ref, w_ref, b_ref, o_ref, acc_ref):
    k = pl.program_id(1)

    @pl.when(k == 0)
    def _():
        acc_ref[...] = jnp.zeros_like(acc_ref)

    # [TM, TK] x [NCp, TK] -> [TM, NCp]; contract the shared dim_in chunk
    # (equivalent to x @ weight.T, without a wrapper-side transpose).
    acc_ref[...] += lax.dot_general(
        x_ref[...], w_ref[...],
        dimension_numbers=(((1,), (1,)), ((), ())),
        preferred_element_type=jnp.float32,
    )

    @pl.when(k == pl.num_programs(1) - 1)
    def _():
        logits = acc_ref[...] + b_ref[...]          # bias added once, at finalize
        m = jnp.max(logits, axis=-1, keepdims=True)
        e = jnp.exp(logits - m)
        denom = jnp.sum(e, axis=-1, keepdims=True)
        r = pl.reciprocal(denom, approx=True)       # EUP vrcp (otherwise-idle slot)
        r = r * (2.0 - denom * r)                   # one Newton step -> ~f32 exact
        o_ref[...] = (e * r).astype(o_ref.dtype)


def classification_basic_head(x, weight, bias, *, block_b=128, block_k=512):
    """Eval-mode forward of ClassificationBasicHead.

    Args:
      x:      [B, dim_in]            activations.
      weight: [num_classes, dim_in]  (native PyTorch nn.Linear layout).
      bias:   [num_classes]
    Returns:
      [B, num_classes] softmax probabilities (softmax over dim=1).
    """
    B, dim_in = x.shape
    num_classes = weight.shape[0]

    # --- derive TPU-friendly padded shapes / tiles -------------------------
    nc_pad = _round_up(num_classes, 128)            # lane-dense class axis
    tm = min(block_b, _round_up(B, 8))              # batch tile (multiple of 8)
    b_pad = _round_up(B, tm)
    tk = dim_in if dim_in <= block_k else block_k   # K tile (reduction axis)
    k_pad = _round_up(dim_in, tk)

    # Zero padding is matmul-neutral; padded classes get a -1e30 bias so they
    # carry ~0 softmax mass.  Pads are no-ops when shapes are already aligned.
    # TODO(synk): for production, pre-pad weight/bias once at model-load time.
    x_p = x if (b_pad == B and k_pad == dim_in) else jnp.pad(
        x, ((0, b_pad - B), (0, k_pad - dim_in)))
    w_p = weight if (nc_pad == num_classes and k_pad == dim_in) else jnp.pad(
        weight, ((0, nc_pad - num_classes), (0, k_pad - dim_in)))
    b_p = bias if nc_pad == num_classes else jnp.pad(
        bias, (0, nc_pad - num_classes), constant_values=-1e30)
    b_p = b_p.reshape(1, nc_pad)

    grid = (b_pad // tm, k_pad // tk)               # reduction (K) axis last

    out = pl.pallas_call(
        _head_kernel,
        out_shape=jax.ShapeDtypeStruct((b_pad, nc_pad), jnp.float32),
        grid_spec=pltpu.PrefetchScalarGridSpec(
            num_scalar_prefetch=0,
            grid=grid,
            in_specs=[
                pl.BlockSpec((tm, tk), lambda i, k: (i, k)),       # x tile
                pl.BlockSpec((nc_pad, tk), lambda i, k: (0, k)),   # weight tile
                pl.BlockSpec((1, nc_pad), lambda i, k: (0, 0)),    # bias (resident)
            ],
            out_specs=pl.BlockSpec((tm, nc_pad), lambda i, k: (i, 0)),
            scratch_shapes=[pltpu.VMEM((tm, nc_pad), jnp.float32)],
        ),
        compiler_params=pltpu.CompilerParams(
            dimension_semantics=("parallel", "arbitrary"),
        ),
    )(x_p, w_p, b_p)

    return out[:B, :num_classes]


if __name__ == "__main__":
    # Small shapes consistent with the module: batch=8, dim_in=32, num_classes=16.
    B, DIM_IN, NUM_CLASSES = 8, 32, 16

    key = jax.random.PRNGKey(0)
    kx, kw, kb = jax.random.split(key, 3)

    # Deterministic synthetic params (shape-compatible with nn.Linear(dim_in, num_classes)).
    bound = 1.0 / (DIM_IN ** 0.5)
    weight = jax.random.uniform(
        kw, (NUM_CLASSES, DIM_IN), jnp.float32, minval=-bound, maxval=bound)
    bias = jax.random.uniform(
        kb, (NUM_CLASSES,), jnp.float32, minval=-bound, maxval=bound)
    x = jax.random.normal(kx, (B, DIM_IN), jnp.float32)

    head = jax.jit(classification_basic_head)
    out = jax.block_until_ready(head(x, weight, bias))

    # Reference: eval-mode forward = dropout(identity) -> linear -> softmax(dim=1).
    ref = jax.nn.softmax(x @ weight.T + bias, axis=1)
    assert out.shape == (B, NUM_CLASSES)
    assert jnp.allclose(out, ref, atol=1e-4, rtol=1e-4), "mismatch vs reference"
    assert jnp.allclose(jnp.sum(out, axis=1), jnp.ones((B,)), atol=1e-4)

    print("KERNEL_OK")
</pallas_src>

<mosaic_0001>
module attributes {stable_mosaic.version = 11 : i64} {
  func.func @_head_kernel(%arg0: i32, %arg1: i32, %arg2: memref<8x32xf32, #tpu.memory_space<vmem>>, %arg3: memref<128x32xf32, #tpu.memory_space<vmem>>, %arg4: memref<1x128xf32, #tpu.memory_space<vmem>>, %arg5: memref<8x128xf32, #tpu.memory_space<vmem>>, %arg6: memref<8x128xf32, #tpu.memory_space<vmem>>) attributes {dimension_semantics = [#tpu.dimension_semantics<parallel>, #tpu.dimension_semantics<arbitrary>], iteration_bounds = array<i64: 1, 1>, scalar_prefetch = 0 : i64, scratch_operands = 1 : i64, tpu.core_type = #tpu.core_type<tc>, window_params = [{transform_indices = @transform_0, window_bounds = array<i64: 8, 32>}, {transform_indices = @transform_1, window_bounds = array<i64: 128, 32>}, {pipeline_mode = #tpu.pipeline_mode<synchronous>, transform_indices = @transform_2, window_bounds = array<i64: 1, 128>}, {transform_indices = @transform_3, window_bounds = array<i64: 8, 128>}]} {
    %c0_i32 = arith.constant 0 : i32
    %0 = arith.cmpi eq, %arg1, %c0_i32 : i32
    %1 = arith.extui %0 : i1 to i32
    %c0_i32_0 = arith.constant 0 : i32
    %2 = arith.cmpi ne, %1, %c0_i32_0 : i32
    scf.if %2 {
      %cst_10 = arith.constant 0.000000e+00 : f32
      %12 = vector.broadcast %cst_10 : f32 to vector<8x128xf32>
      %c0_11 = arith.constant 0 : index
      %c0_12 = arith.constant 0 : index
      %13 = vector.load %arg6[%c0_11, %c0_12] : memref<8x128xf32, #tpu.memory_space<vmem>>, vector<8x128xf32>
      tpu.vector_store %arg6[%c0_11, %c0_12], %12 {strides = array<i32>} : memref<8x128xf32, #tpu.memory_space<vmem>>, vector<8x128xf32>,
    } else {
    }
    %c0 = arith.constant 0 : index
    %c0_1 = arith.constant 0 : index
    %3 = vector.load %arg6[%c0, %c0_1] : memref<8x128xf32, #tpu.memory_space<vmem>>, vector<8x128xf32>
    %c0_2 = arith.constant 0 : index
    %c0_3 = arith.constant 0 : index
    %4 = vector.load %arg2[%c0_2, %c0_3] : memref<8x32xf32, #tpu.memory_space<vmem>>, vector<8x32xf32>
    %c0_4 = arith.constant 0 : index
    %c0_5 = arith.constant 0 : index
    %5 = vector.load %arg3[%c0_4, %c0_5] : memref<128x32xf32, #tpu.memory_space<vmem>>, vector<128x32xf32>
    %cst = arith.constant dense<0.000000e+00> : vector<8x128xf32>
    %6 = tpu.matmul %4, %5, %cst {dimension_numbers = #tpu.dot_dimension_numbers<[1], [1], [0], [0], [0, 0, 1, 0], [], []>} : vector<8x32xf32>, vector<128x32xf32>, vector<8x128xf32> -> vector<8x128xf32>
    %7 = arith.addf %3, %6 : vector<8x128xf32>
    %c0_6 = arith.constant 0 : index
    %c0_7 = arith.constant 0 : index
    %8 = vector.load %arg6[%c0_6, %c0_7] : memref<8x128xf32, #tpu.memory_space<vmem>>, vector<8x128xf32>
    tpu.vector_store %arg6[%c0_6, %c0_7], %7 {strides = array<i32>} : memref<8x128xf32, #tpu.memory_space<vmem>>, vector<8x128xf32>,
    %c0_i32_8 = arith.constant 0 : i32
    %9 = arith.cmpi eq, %arg1, %c0_i32_8 : i32
    %10 = arith.extui %9 : i1 to i32
    %c0_i32_9 = arith.constant 0 : i32
    %11 = arith.cmpi ne, %10, %c0_i32_9 : i32
    scf.if %11 {
      %c0_10 = arith.constant 0 : index
      %c0_11 = arith.constant 0 : index
      %12 = vector.load %arg6[%c0_10, %c0_11] : memref<8x128xf32, #tpu.memory_space<vmem>>, vector<8x128xf32>
      %c0_12 = arith.constant 0 : index
      %c0_13 = arith.constant 0 : index
      %13 = vector.load %arg4[%c0_12, %c0_13] : memref<1x128xf32, #tpu.memory_space<vmem>>, vector<1x128xf32>
      %14 = vector.broadcast %13 : vector<1x128xf32> to vector<8x128xf32>
      %15 = arith.addf %12, %14 : vector<8x128xf32>
      %cst_14 = arith.constant dense<0xFF800000> : vector<8xf32>
      %16 = vector.multi_reduction <maximumf>, %15, %cst_14 [1] : vector<8x128xf32> to vector<8xf32>
      %17 = vector.shape_cast %16 : vector<8xf32> to vector<8x1xf32>
      %18 = vector.broadcast %17 : vector<8x1xf32> to vector<8x128xf32>
      %19 = arith.subf %15, %18 : vector<8x128xf32>
      %20 = math.exp %19 : vector<8x128xf32>
      %cst_15 = arith.constant dense<0.000000e+00> : vector<8xf32>
      %21 = vector.multi_reduction <add>, %20, %cst_15 [1] : vector<8x128xf32> to vector<8xf32>
      %22 = vector.shape_cast %21 : vector<8xf32> to vector<8x1xf32>
      %23 = tpu.reciprocal %22 {approx = true} : vector<8x1xf32> -> vector<8x1xf32>
      %24 = arith.mulf %22, %23 : vector<8x1xf32>
      %cst_16 = arith.constant 2.000000e+00 : f32
      %25 = vector.broadcast %cst_16 : f32 to vector<8x1xf32>
      %26 = arith.subf %25, %24 : vector<8x1xf32>
      %27 = arith.mulf %23, %26 : vector<8x1xf32>
      %28 = vector.broadcast %27 : vector<8x1xf32> to vector<8x128xf32>
      %29 = arith.mulf %20, %28 : vector<8x128xf32>
      %c0_17 = arith.constant 0 : index
      %c0_18 = arith.constant 0 : index
      %30 = vector.load %arg5[%c0_17, %c0_18] : memref<8x128xf32, #tpu.memory_space<vmem>>, vector<8x128xf32>
      tpu.vector_store %arg5[%c0_17, %c0_18], %29 {strides = array<i32>} : memref<8x128xf32, #tpu.memory_space<vmem>>, vector<8x128xf32>,
    } else {
    }
    return
  }
  func.func @transform_0(%arg0: i32, %arg1: i32) -> (i32, i32) {
    %c0_i32 = arith.constant 0 : i32
    return %arg0, %arg1 : i32, i32
  }
  func.func @transform_1(%arg0: i32, %arg1: i32) -> (i32, i32) {
    %c0_i32 = arith.constant 0 : i32
    %c0_i32_0 = arith.constant 0 : i32
    return %c0_i32, %arg1 : i32, i32
  }
  func.func @transform_2(%arg0: i32, %arg1: i32) -> (i32, i32) {
    %c0_i32 = arith.constant 0 : i32
    %c0_i32_0 = arith.constant 0 : i32
    %c0_i32_1 = arith.constant 0 : i32
    return %c0_i32, %c0_i32_0 : i32, i32
  }
  func.func @transform_3(%arg0: i32, %arg1: i32) -> (i32, i32) {
    %c0_i32 = arith.constant 0 : i32
    %c0_i32_0 = arith.constant 0 : i32
    return %arg0, %c0_i32 : i32, i32
  }
}

</mosaic_0001>

<bundles_post_ra>
// kernel: classification_basic_head.1
= control target key start
LH: loop header
LB: loop body
LE: loop exit
PB: predicated region body
PF: predicated region fallthrough
CT: control target
= control target key end

     0   :  { %vm38_vm0 = vcmask 261120   ;;  %s294_s0 = inlined_call_operand.vmem [shape: f32[8,32], index: 0, kind: input, shape index: {}]   ;;  %s295_s1 = inlined_call_operand.vmem [shape: f32[128,32], index: 1, kind: input, shape index: {}]   ;;  %s296_s2 = inlined_call_operand.vmem [shape: f32[1,128], index: 2, kind: input, shape index: {}]   ;;  %s297_s3 = inlined_call_operand.hbm [shape: f32[8,128], index: 3, kind: output, shape index: {}]  }
   0x1   :  { %v37_v0 = vld [vmem:[%s295_s1 + $0x78] sm:$0xff]  ;;  %v36_v1 = vld [vmem:[%s295_s1 + $0x70] sm:$0xff] }
   0x2   :  { %150 = vmatpush.xpose.msk.msra.mxu0 %vm38_vm0, %v37_v0 }
   0x3   :  { %8 = vsyncpa [#allocation4], 0  ;;  %v35_v2 = vld [vmem:[%s295_s1 + $0x68] sm:$0xff]  ;;  %v34_v3 = vld [vmem:[%s295_s1 + $0x60] sm:$0xff] }
   0x4   :  { %v33_v4 = vld [vmem:[%s295_s1 + $0x58] sm:$0xff]  ;;  %v32_v5 = vld [vmem:[%s295_s1 + $0x50] sm:$0xff]  ;;  %v31_v6 = vld [vmem:[%s295_s1 + $0x48] sm:$0xff] }
   0x5   :  { %v30_v7 = vld [vmem:[%s295_s1 + $0x40] sm:$0xff]  ;;  %v29_v8 = vld [vmem:[%s295_s1 + $0x38] sm:$0xff]  ;;  %v28_v9 = vld [vmem:[%s295_s1 + $0x30] sm:$0xff] }
   0x6   :  { %151 = vmatpush.xpose.msk.msra.mxu0 %vm38_vm0, %v36_v1  ;;  %v27_v10 = vld [vmem:[%s295_s1 + $0x28] sm:$0xff]  ;;  %v26_v11 = vld [vmem:[%s295_s1 + $0x20] sm:$0xff]  ;;  %v25_v12 = vld [vmem:[%s295_s1 + $0x18] sm:$0xff] }
   0x7   :  { %v24_v13 = vld [vmem:[%s295_s1 + $0x10] sm:$0xff]  ;;  %v23_v14 = vld [vmem:[%s295_s1 + $0x8] sm:$0xff]  ;;  %v22_v15 = vld [vmem:[%s295_s1] sm:$0xff] }
   0x8   :  { %v21_v16 = vld [vmem:[%s294_s0] sm:$0xff]  ;;  %s199_s0 = smov [#allocation3]  }
   0x9   :  { %v168_v17 = vld [vmem:[%s296_s2] ss:$0 sm:$0xff]  ;;  %s139_s1 = sshll.u32 %s199_s0, 4  ;;  %s141_s2 = sshll.u32 %s297_s3, 4  ;;  %s140_s1 = int_to_ptr.vmem [resolvable:$true] %s139_s1  ;;  %s142_s2 = int_to_ptr.hbm [resolvable:$true] %s141_s2 }
   0xa   :  { %152 = vmatpush.xpose.msk.msra.mxu0 %vm38_vm0, %v35_v2 }
   0xe   :  { %153 = vmatpush.xpose.msk.msra.mxu0 %vm38_vm0, %v34_v3 }
  0x12   :  { %154 = vmatpush.xpose.msk.msra.mxu0 %vm38_vm0, %v33_v4 }
  0x16   :  { %155 = vmatpush.xpose.msk.msra.mxu0 %vm38_vm0, %v32_v5 }
  0x1a   :  { %156 = vmatpush.xpose.msk.msra.mxu0 %vm38_vm0, %v31_v6 }
  0x1e   :  { %157 = vmatpush.xpose.msk.msra.mxu0 %vm38_vm0, %v30_v7 }
  0x22   :  { %158 = vmatpush.xpose.msk.msra.mxu0 %vm38_vm0, %v29_v8 }
  0x26   :  { %159 = vmatpush.xpose.msk.msra.mxu0 %vm38_vm0, %v28_v9 }
  0x2a   :  { %160 = vmatpush.xpose.msk.msra.mxu0 %vm38_vm0, %v27_v10 }
  0x2e   :  { %161 = vmatpush.xpose.msk.msra.mxu0 %vm38_vm0, %v26_v11 }
  0x32   :  { %162 = vmatpush.xpose.msk.msra.mxu0 %vm38_vm0, %v25_v12 }
  0x36   :  { %163 = vmatpush.xpose.msk.msra.mxu0 %vm38_vm0, %v24_v13 }
  0x3a   :  { %164 = vmatpush.xpose.msk.msra.mxu0 %vm38_vm0, %v23_v14 }
  0x3e   :  { %165 = vmatpush.xpose.msk.msra.mxu0 %vm38_vm0, %v22_v15 }
  0x41   :  { %166 = vmatmul.msk.f32.vlgmr.msra.gmra.mxu0 %vm38_vm0, %v21_v16 }
  0xbe   :  { %v107_v18 = vpop.f32.mrf.mxu0 }
  0xbf   :  { %v120_v19 = vadd.f32 %v168_v17, %v107_v18 }
  0xc1   :  { %121 = vmax.xlane.f32.xlu0 %v120_v19 }
 0x134   :  { %v122_v20 = vpop.xlane.xlu0 %121 }
 0x135   :  { %v123_v21 = vsub.f32 %v120_v19, %v122_v20 }
 0x137   :  { %v124_v22 = vmul.f32 1.442695, %v123_v21 }
 0x139   :  { %169 = vpow2.f32 %v124_v22 }
 0x13f   :  { %v170_v23 = vpop.eup %169 }
 0x140   :  { %126 = vadd.xlane.f32.xlu0 %v170_v23 }
 0x1b3   :  { %v127_v24 = vpop.xlane.xlu0 %126 }
 0x1b4   :  { %171 = vrcp.f32 %v127_v24 }
 0x1ba   :  { %v172_v25 = vpop.eup %171 }
 0x1bb   :  { %v129_v26 = vmul.f32 %v172_v25, %v127_v24 }
 0x1bd   :  { %v130_v27 = vsub.f32 2.0, %v129_v26 }
 0x1bf   :  { %v131_v28 = vmul.f32 %v172_v25, %v130_v27 }
 0x1c1   :  { %v132_v29 = vmul.f32 %v170_v23, %v131_v28 }
 0x1c3   :  { %133 = vst [vmem:[#allocation3] sm:$0xff] %v132_v29 }
 0x1c4   :  { %144 = dma.vmem_to_hbm [thread:$0]  %s140_s1, 128, %s142_s2, [#allocation4]  }
 0x1c5   :  { %197 = dma.done.wait [#allocation4], 128  }
 0x1c6   :  { %198 = vsyncadd [#allocation4], 4294967168 }
 0x1c7   :  { %149 = vsyncpa [#allocation4], 1 }

</bundles_post_ra>
